<compile_context>
chip_gen: v7x
topology: tpu7x:2x2x1
jax: 0.10.0
libtpu: 0.0.40
codegen_flags: <defaults>
</compile_context>

<pallas_src>
import functools

import jax
import jax.numpy as jnp
from jax import lax
from jax.experimental import pallas as pl
from jax.experimental.pallas import tpu as pltpu

_LANE = 128      # lane width (last-dim alignment)
_SUBLANE = 16    # sublane alignment (covers bf16 packing as well)


def _round_up(v: int, m: int) -> int:
    return -(-v // m) * m


def _vmem_budget_bytes() -> int:
    """Per-kernel VMEM budget: half of physical VMEM, capped at 64 MiB.

    v5e/v6e: 128 MiB physical -> 64 MiB budget.  v7x: 64 MiB -> 32 MiB.
    """
    cap = 64 << 20
    try:
        cap = int(getattr(pltpu.get_tpu_info(), "vmem_capacity_bytes", cap))
    except Exception:   # no hardware info available (e.g. interpret mode)
        pass
    return max(16 << 20, min(cap // 2, 64 << 20))


def _pick_tile(dim: int, align: int, cap: int) -> tuple[int, int]:
    """Return (tile, padded_dim): tile % align == 0 and tile | padded_dim.

    Prefers a divisor of the 128-aligned dim so the (large) weight never needs
    a padded HBM copy; accepts padding only when the best divisor is small
    (tiny tiles wreck arithmetic intensity and multiply grid-step overhead).
    """
    aligned = _round_up(dim, align)
    if aligned <= cap:
        return aligned, aligned
    best = 0
    for t in range(cap, align - 1, -align):
        if aligned % t == 0:
            best = t
            break
    floor = min(cap, max(align, 2 * _LANE))
    if best >= floor:
        return best, aligned
    # No acceptably-large divisor: pad out to cap-sized tiles instead of
    # collapsing (e.g. K=N=11008 keeps 256-wide tiles, no padding needed).
    return cap, _round_up(dim, cap)


def _working_set_bytes(tm, tn, tk, r_pad, in_b, out_b, *, fuse, has_bias, use_acc):
    ws = 2 * tk * (tm + tn) * in_b          # x + W tiles, double-buffered
    ws += 2 * tm * tn * out_b               # output tile, double-buffered
    if use_acc:
        ws += tm * tn * 4                   # f32 accumulator scratch
    if fuse:
        ws += 2 * (tm + tn) * r_pad * 4     # VMEM-resident rank-r xp / delta
    else:
        ws += 2 * tm * tn * 4               # precomputed f32 correction tile
    if has_bias:
        ws += 2 * tn * 4
    return ws


def _paca_linear_kernel(*refs, has_bias: bool, fuse_rank_r: bool, use_acc: bool):
    """One (tm, tn) output tile, accumulating over the K grid axis."""
    it = iter(refs)
    x_ref = next(it)
    w_ref = next(it)
    xp_ref = d_ref = corr_ref = b_ref = None
    if fuse_rank_r:
        xp_ref = next(it)
        d_ref = next(it)
    else:
        corr_ref = next(it)
    if has_bias:
        b_ref = next(it)
    o_ref = next(it)
    acc_ref = next(it) if use_acc else o_ref   # f32 output: accumulate in place

    k = pl.program_id(2)

    # K-step 0: initialize the accumulator with the rank-r paca correction
    #   x[:, idx] @ (scaling*paca_w - W[:, idx]).T
    # either fused here from small VMEM-resident f32 tiles, or (short-K case)
    # precomputed once in plain XLA and streamed in.
    @pl.when(k == 0)
    def _():
        if fuse_rank_r:
            acc_ref[...] = lax.dot_general(
                xp_ref[...], d_ref[...],
                dimension_numbers=(((1,), (1,)), ((), ())),
                preferred_element_type=jnp.float32,
            ).astype(acc_ref.dtype)
        else:
            acc_ref[...] = corr_ref[...].astype(acc_ref.dtype)

    # Base matmul: x tile (tm, tk) contracted with W tile (tn, tk) along K.
    # Weight stays in its native (out, in) = (N, K) layout -> no HBM transpose.
    # TODO(synk): if a v5e bundle dump shows per-tile vxpose for this
    # transposed-RHS contraction, pre-transpose the static W once to (K, N).
    acc_ref[...] += lax.dot_general(
        x_ref[...], w_ref[...],
        dimension_numbers=(((1,), (1,)), ((), ())),
        preferred_element_type=jnp.float32,
    ).astype(acc_ref.dtype)

    if use_acc or has_bias:
        @pl.when(k == pl.num_programs(2) - 1)
        def _():
            acc = acc_ref[...].astype(jnp.float32)
            if has_bias:
                acc = acc + b_ref[...]          # f32 bias add before downcast
            o_ref[...] = acc.astype(o_ref.dtype)


def _paca_matmul(x2d, w_nk, xp, d, corr, bias, out_dtype, *,
                 tm, tn, tk, r_pad, fuse_rank_r, vmem_limit):
    """out = x2d @ w_nk.T + rank-r correction (+ bias). Dims pre-padded."""
    M, K = x2d.shape
    N = w_nk.shape[0]
    has_bias = bias is not None
    use_acc = jnp.dtype(out_dtype) != jnp.dtype(jnp.float32)

    in_specs = [
        pl.BlockSpec((tm, tk), lambda i, j, k: (i, k)),   # x tile
        pl.BlockSpec((tn, tk), lambda i, j, k: (j, k)),   # W tile (N, K layout)
    ]
    args = [x2d, w_nk]
    if fuse_rank_r:
        in_specs += [
            pl.BlockSpec((tm, r_pad), lambda i, j, k: (i, 0)),  # pruned x (f32)
            pl.BlockSpec((tn, r_pad), lambda i, j, k: (j, 0)),  # rank-r delta
        ]
        args += [xp, d]
    else:
        in_specs.append(pl.BlockSpec((tm, tn), lambda i, j, k: (i, j)))  # corr
        args.append(corr)
    if has_bias:
        in_specs.append(pl.BlockSpec((1, tn), lambda i, j, k: (0, j)))   # bias
        args.append(bias)

    in_b = jnp.dtype(x2d.dtype).itemsize
    out_b = jnp.dtype(out_dtype).itemsize
    flops = 2 * M * N * K + (2 * M * N * r_pad if fuse_rank_r else 0)
    bytes_accessed = (M * K + N * K) * in_b + M * N * out_b
    bytes_accessed += (M + N) * r_pad * 4 if fuse_rank_r else M * N * 4
    if has_bias:
        bytes_accessed += N * 4

    scratch = [pltpu.VMEM((tm, tn), jnp.float32)] if use_acc else []

    return pl.pallas_call(
        functools.partial(_paca_linear_kernel, has_bias=has_bias,
                          fuse_rank_r=fuse_rank_r, use_acc=use_acc),
        out_shape=jax.ShapeDtypeStruct((M, N), out_dtype),
        grid_spec=pltpu.PrefetchScalarGridSpec(
            num_scalar_prefetch=0,
            grid=(M // tm, N // tn, K // tk),   # exact: inputs pre-padded
            in_specs=in_specs,
            out_specs=pl.BlockSpec((tm, tn), lambda i, j, k: (i, j)),
            scratch_shapes=scratch,
        ),
        compiler_params=pltpu.CompilerParams(
            dimension_semantics=("parallel", "parallel", "arbitrary"),
            vmem_limit_bytes=int(vmem_limit),
        ),
        cost_estimate=pl.CostEstimate(
            flops=flops, transcendentals=0, bytes_accessed=bytes_accessed),
    )(*args)


@functools.partial(jax.jit, static_argnames=("compute_dtype",))
def paca_linear_forward(x, weight, bias, paca_w, paca_indices, scaling,
                        compute_dtype=None):
    """Forward of paca Linear.

    x:            (..., in_features)
    weight:       (out_features, in_features)   -- base nn.Linear layout
    bias:         (out_features,) or None
    paca_w:       (out_features, r)
    paca_indices: (r,) int (randperm -> unique; duplicates would change the
                  PyTorch last-write-wins scatter semantics)
    compute_dtype: optional MXU operand dtype (jnp.bfloat16 recommended on
                  v6e/v7x); accumulation and bias add stay f32.
    """
    out_features, in_features = weight.shape
    lead_shape = x.shape[:-1]
    x2d = x.reshape(-1, in_features)
    M, K = x2d.shape
    N = out_features
    r = paca_w.shape[1]

    out_dtype = x.dtype
    cdt = jnp.dtype(compute_dtype) if compute_dtype is not None else jnp.dtype(x.dtype)

    # ---- rank-r reformulation glue (plain JAX, O(N*r + M*r) data) ----------
    w_cols = jnp.take(weight, paca_indices, axis=1).astype(jnp.float32)   # (N, r)
    pw_eff = (paca_w.astype(jnp.float32) * scaling).astype(weight.dtype)  # scatter cast
    d32 = pw_eff.astype(jnp.float32) - w_cols                             # (N, r)
    xp32 = jnp.take(x2d, paca_indices, axis=1).astype(jnp.float32)        # (M, r)

    # ---- static, VMEM-budgeted tile selection ------------------------------
    in_b = cdt.itemsize
    out_b = jnp.dtype(out_dtype).itemsize
    use_acc = jnp.dtype(out_dtype) != jnp.dtype(jnp.float32)
    has_bias = bias is not None
    budget = _vmem_budget_bytes()
    r_pad = _round_up(r, _LANE)

    tm = min(512, _round_up(M, _SUBLANE))
    m_pad = _round_up(M, tm)
    fuse_rank_r = True
    tn = tk = n_pad = k_pad = _LANE
    for tn_cap, tk_cap in ((1024, 1024), (1024, 512), (512, 512), (512, 256),
                           (256, 256), (256, 128), (128, 128)):
        tn, n_pad = _pick_tile(N, _LANE, tn_cap)
        tk, k_pad = _pick_tile(K, _LANE, tk_cap)
        # Fuse the rank-r correction only when it is <5% of the K sweep;
        # otherwise precompute it in XLA and feed it as the k==0 init
        # (avoids an oversized 128-lane correction matmul on short-K layers).
        fuse_rank_r = 20 * r_pad <= k_pad
        if _working_set_bytes(tm, tn, tk, r_pad, in_b, out_b, fuse=fuse_rank_r,
                              has_bias=has_bias, use_acc=use_acc) <= budget:
            break

    # Small-M (decode-like) shapes: ensure the parallel i*j grid has >= 2
    # blocks so both v7x TensorCores (megacore) get work.
    if m_pad // tm == 1 and n_pad // tn == 1 and n_pad >= 2 * _LANE:
        tn, n_pad = _pick_tile(N, _LANE, max(_LANE, (n_pad // 2) // _LANE * _LANE))

    # ---- zero-pad / cast only where needed ----------------------------------
    # TODO(synk): when the full weight does need padding (dims with no decent
    # 128-multiple divisor), pad it once caller-side and cache it across steps
    # (the weight is static) instead of re-padding per call here.
    def pad2(a, rows, cols, dtype):
        a = a.astype(dtype)
        pr, pc = rows - a.shape[0], cols - a.shape[1]
        if pr or pc:
            a = jnp.pad(a, ((0, pr), (0, pc)))
        return a

    x2d_p = pad2(x2d, m_pad, k_pad, cdt)
    w_p = pad2(weight, n_pad, k_pad, cdt)
    b_p = pad2(bias.reshape(1, N), 1, n_pad, jnp.float32) if has_bias else None

    xp_p = d_p = corr_p = None
    if fuse_rank_r:
        # xp/d stay f32: tiles are tiny and keeping the correction in f32
        # limits cancellation error in the add-and-subtract reformulation.
        xp_p = pad2(xp32, m_pad, r_pad, jnp.float32)
        d_p = pad2(d32, n_pad, r_pad, jnp.float32)
    else:
        corr = lax.dot_general(xp32, d32,
                               dimension_numbers=(((1,), (1,)), ((), ())),
                               preferred_element_type=jnp.float32)
        corr_p = pad2(corr, m_pad, n_pad, jnp.float32)

    out = _paca_matmul(x2d_p, w_p, xp_p, d_p, corr_p, b_p, out_dtype,
                       tm=tm, tn=tn, tk=tk, r_pad=r_pad,
                       fuse_rank_r=fuse_rank_r, vmem_limit=budget)
    out = out[:M, :N]
    return out.reshape(*lead_shape, out_features)


def _reference(x, weight, bias, paca_w, paca_indices, scaling):
    w = weight.astype(jnp.float32)
    pw = (paca_w.astype(jnp.float32) * scaling).astype(weight.dtype).astype(jnp.float32)
    w_eff = w.at[:, paca_indices].set(pw)
    out = x.astype(jnp.float32) @ w_eff.T
    if bias is not None:
        out = out + bias.astype(jnp.float32)
    return out


if __name__ == "__main__":
    key = jax.random.PRNGKey(0)

    # ---- test 1: small shapes matching the module example ------------------
    batch, seq = 2, 8
    in_features, out_features = 32, 64
    r, paca_alpha = 8, 16
    scaling = paca_alpha / r

    k_x, k_w, k_b, k_perm, k2 = jax.random.split(key, 5)
    weight = jax.random.normal(k_w, (out_features, in_features), jnp.float32) * 0.05
    bias = jax.random.normal(k_b, (out_features,), jnp.float32) * 0.01
    paca_indices = jax.random.permutation(k_perm, in_features)[:r]   # unique
    paca_w = weight[:, paca_indices] / scaling                       # paca_init
    x = jax.random.normal(k_x, (batch, seq, in_features), jnp.float32)

    out = jax.block_until_ready(
        paca_linear_forward(x, weight, bias, paca_w, paca_indices, scaling))
    ref = _reference(x, weight, bias, paca_w, paca_indices, scaling)
    assert out.shape == (batch, seq, out_features)
    assert jnp.allclose(out, ref, atol=1e-5, rtol=1e-5)

    # no-bias path (skips the bias DMA/add entirely)
    out_nb = jax.block_until_ready(
        paca_linear_forward(x, weight, None, paca_w, paca_indices, scaling))
    ref_nb = _reference(x, weight, None, paca_w, paca_indices, scaling)
    assert jnp.allclose(out_nb, ref_nb, atol=1e-5, rtol=1e-5)

    # ---- test 2: short-K layer -> XLA-precomputed rank-r correction path,
    #      f32 output accumulated directly in the output block --------------
    in2, out2, r2 = 640, 256, 16
    scaling2 = 24 / r2
    k_x2, k_w2, k_b2, k_p2, k_pw2, k3 = jax.random.split(k2, 6)
    weight2 = jax.random.normal(k_w2, (out2, in2), jnp.float32) * 0.05
    bias2 = jax.random.normal(k_b2, (out2,), jnp.float32) * 0.01
    idx2 = jax.random.permutation(k_p2, in2)[:r2]
    paca_w2 = jax.random.normal(k_pw2, (out2, r2), jnp.float32) * 0.05
    x2 = jax.random.normal(k_x2, (batch, seq, in2), jnp.float32)

    out2_v = jax.block_until_ready(
        paca_linear_forward(x2, weight2, bias2, paca_w2, idx2, scaling2))
    ref2 = _reference(x2, weight2, bias2, paca_w2, idx2, scaling2)
    assert out2_v.shape == (batch, seq, out2)
    assert jnp.allclose(out2_v, ref2, atol=5e-5, rtol=5e-5)

    # ---- test 3: long-K bf16 path -> bf16 MXU operands + f32 accumulation,
    #      fused in-kernel rank-r correction, multi-step K, split-N grid -----
    in3, out3, r3 = 4096, 256, 16
    scaling3 = 32 / r3
    k_x3, k_w3, k_b3, k_p3, k_pw3 = jax.random.split(k3, 5)
    weight3 = (jax.random.normal(k_w3, (out3, in3), jnp.float32) * 0.05
               ).astype(jnp.bfloat16)
    bias3 = (jax.random.normal(k_b3, (out3,), jnp.float32) * 0.01
             ).astype(jnp.bfloat16)
    idx3 = jax.random.permutation(k_p3, in3)[:r3]
    paca_w3 = (jax.random.normal(k_pw3, (out3, r3), jnp.float32) * 0.05
               ).astype(jnp.bfloat16)
    x3 = jax.random.normal(k_x3, (batch, seq, in3), jnp.float32).astype(jnp.bfloat16)

    out3_v = jax.block_until_ready(
        paca_linear_forward(x3, weight3, bias3, paca_w3, idx3, scaling3,
                            compute_dtype=jnp.bfloat16))
    ref3 = _reference(x3, weight3, bias3, paca_w3, idx3, scaling3)
    assert out3_v.shape == (batch, seq, out3)
    assert out3_v.dtype == jnp.bfloat16
    assert jnp.allclose(out3_v.astype(jnp.float32), ref3, atol=5e-2, rtol=2e-2)

    # TODO(synk): adapter bookkeeping (merge/unmerge, mixed-batch adapter_names,
    # gradient-accumulation-gated paca_update cadence, custom backward) is
    # host-side module state, not part of the forward kernel.
    print("KERNEL_OK")
</pallas_src>

<mosaic_0001>
module attributes {stable_mosaic.version = 11 : i64} {
  func.func @_paca_linear_kernel(%arg0: i32, %arg1: i32, %arg2: i32, %arg3: memref<16x128xf32, #tpu.memory_space<vmem>>, %arg4: memref<128x128xf32, #tpu.memory_space<vmem>>, %arg5: memref<16x128xf32, #tpu.memory_space<vmem>>, %arg6: memref<1x128xf32, #tpu.memory_space<vmem>>, %arg7: memref<16x128xf32, #tpu.memory_space<vmem>>) attributes {dimension_semantics = [#tpu.dimension_semantics<parallel>, #tpu.dimension_semantics<parallel>, #tpu.dimension_semantics<arbitrary>], iteration_bounds = array<i64: 1, 1, 1>, scalar_prefetch = 0 : i64, scratch_operands = 0 : i64, tpu.core_type = #tpu.core_type<tc>, window_params = [{transform_indices = @transform_0, window_bounds = array<i64: 16, 128>}, {transform_indices = @transform_1, window_bounds = array<i64: 128, 128>}, {transform_indices = @transform_2, window_bounds = array<i64: 16, 128>}, {transform_indices = @transform_3, window_bounds = array<i64: 1, 128>}, {transform_indices = @transform_4, window_bounds = array<i64: 16, 128>}]} {
    %c0_i32 = arith.constant 0 : i32
    %0 = arith.cmpi eq, %arg2, %c0_i32 : i32
    %1 = arith.extui %0 : i1 to i32
    %c0_i32_0 = arith.constant 0 : i32
    %2 = arith.cmpi ne, %1, %c0_i32_0 : i32
    scf.if %2 {
      %c0_10 = arith.constant 0 : index
      %c0_11 = arith.constant 0 : index
      %12 = vector.load %arg5[%c0_10, %c0_11] : memref<16x128xf32, #tpu.memory_space<vmem>>, vector<16x128xf32>
      %c0_12 = arith.constant 0 : index
      %c0_13 = arith.constant 0 : index
      %13 = vector.load %arg7[%c0_12, %c0_13] : memref<16x128xf32, #tpu.memory_space<vmem>>, vector<16x128xf32>
      tpu.vector_store %arg7[%c0_12, %c0_13], %12 {strides = array<i32>} : memref<16x128xf32, #tpu.memory_space<vmem>>, vector<16x128xf32>,
    } else {
    }
    %c0 = arith.constant 0 : index
    %c0_1 = arith.constant 0 : index
    %3 = vector.load %arg7[%c0, %c0_1] : memref<16x128xf32, #tpu.memory_space<vmem>>, vector<16x128xf32>
    %c0_2 = arith.constant 0 : index
    %c0_3 = arith.constant 0 : index
    %4 = vector.load %arg3[%c0_2, %c0_3] : memref<16x128xf32, #tpu.memory_space<vmem>>, vector<16x128xf32>
    %c0_4 = arith.constant 0 : index
    %c0_5 = arith.constant 0 : index
    %5 = vector.load %arg4[%c0_4, %c0_5] : memref<128x128xf32, #tpu.memory_space<vmem>>, vector<128x128xf32>
    %cst = arith.constant dense<0.000000e+00> : vector<16x128xf32>
    %6 = tpu.matmul %4, %5, %cst {dimension_numbers = #tpu.dot_dimension_numbers<[1], [1], [0], [0], [0, 0, 1, 0], [], []>} : vector<16x128xf32>, vector<128x128xf32>, vector<16x128xf32> -> vector<16x128xf32>
    %7 = arith.addf %3, %6 : vector<16x128xf32>
    %c0_6 = arith.constant 0 : index
    %c0_7 = arith.constant 0 : index
    %8 = vector.load %arg7[%c0_6, %c0_7] : memref<16x128xf32, #tpu.memory_space<vmem>>, vector<16x128xf32>
    tpu.vector_store %arg7[%c0_6, %c0_7], %7 {strides = array<i32>} : memref<16x128xf32, #tpu.memory_space<vmem>>, vector<16x128xf32>,
    %c0_i32_8 = arith.constant 0 : i32
    %9 = arith.cmpi eq, %arg2, %c0_i32_8 : i32
    %10 = arith.extui %9 : i1 to i32
    %c0_i32_9 = arith.constant 0 : i32
    %11 = arith.cmpi ne, %10, %c0_i32_9 : i32
    scf.if %11 {
      %c0_10 = arith.constant 0 : index
      %c0_11 = arith.constant 0 : index
      %12 = vector.load %arg7[%c0_10, %c0_11] : memref<16x128xf32, #tpu.memory_space<vmem>>, vector<16x128xf32>
      %c0_12 = arith.constant 0 : index
      %c0_13 = arith.constant 0 : index
      %13 = vector.load %arg6[%c0_12, %c0_13] : memref<1x128xf32, #tpu.memory_space<vmem>>, vector<1x128xf32>
      %14 = vector.broadcast %13 : vector<1x128xf32> to vector<16x128xf32>
      %15 = arith.addf %12, %14 : vector<16x128xf32>
      %c0_14 = arith.constant 0 : index
      %c0_15 = arith.constant 0 : index
      %16 = vector.load %arg7[%c0_14, %c0_15] : memref<16x128xf32, #tpu.memory_space<vmem>>, vector<16x128xf32>
      tpu.vector_store %arg7[%c0_14, %c0_15], %15 {strides = array<i32>} : memref<16x128xf32, #tpu.memory_space<vmem>>, vector<16x128xf32>,
    } else {
    }
    return
  }
  func.func @transform_0(%arg0: i32, %arg1: i32, %arg2: i32) -> (i32, i32) {
    %c0_i32 = arith.constant 0 : i32
    return %arg0, %arg2 : i32, i32
  }
  func.func @transform_1(%arg0: i32, %arg1: i32, %arg2: i32) -> (i32, i32) {
    %c0_i32 = arith.constant 0 : i32
    return %arg1, %arg2 : i32, i32
  }
  func.func @transform_2(%arg0: i32, %arg1: i32, %arg2: i32) -> (i32, i32) {
    %c0_i32 = arith.constant 0 : i32
    return %arg0, %arg1 : i32, i32
  }
  func.func @transform_3(%arg0: i32, %arg1: i32, %arg2: i32) -> (i32, i32) {
    %c0_i32 = arith.constant 0 : i32
    %c0_i32_0 = arith.constant 0 : i32
    return %c0_i32, %arg1 : i32, i32
  }
  func.func @transform_4(%arg0: i32, %arg1: i32, %arg2: i32) -> (i32, i32) {
    %c0_i32 = arith.constant 0 : i32
    return %arg0, %arg1 : i32, i32
  }
}

</mosaic_0001>

<bundles_post_ra>
// kernel: paca_linear_forward.1
= control target key start
LH: loop header
LB: loop body
LE: loop exit
PB: predicated region body
PF: predicated region fallthrough
CT: control target
= control target key end

     0   :  { %s324_s1 = inlined_call_operand.vmem [shape: f32[128,128], index: 1, kind: input, shape index: {}]   ;;  %s325_s0 = inlined_call_operand.vmem [shape: f32[16,128], index: 0, kind: input, shape index: {}]   ;;  %s326_s2 = inlined_call_operand.vmem [shape: f32[16,128], index: 2, kind: input, shape index: {}]   ;;  %s327_s3 = inlined_call_operand.vmem [shape: f32[1,128], index: 3, kind: input, shape index: {}]   ;;  %s328_s4 = inlined_call_operand.vmem [shape: f32[16,128], index: 4, kind: output, shape index: {}]  }
   0x1   :  { %v29_v0 = vld [vmem:[%s324_s1] sm:$0xff]  ;;  %v30_v1 = vld [vmem:[%s324_s1 + $0x8] sm:$0xff]  ;;  %v31_v2 = vld [vmem:[%s324_s1 + $0x10] sm:$0xff] }
   0x2   :  { %v198_v3 = vpack.c.bf16 %v30_v1, %v29_v0  ;;  %v32_v4 = vld [vmem:[%s324_s1 + $0x18] sm:$0xff]  ;;  %v27_v6 = vld [vmem:[%s325_s0] sm:$0xff]  ;;  %v34_v8 = vld [vmem:[%s324_s1 + $0x28] sm:$0xff] }
   0x3   :  { %v202_v5 = vpack.c.bf16 %v32_v4, %v31_v2  ;;  %v33_v7 = vld [vmem:[%s324_s1 + $0x20] sm:$0xff]  ;;  %195 = vmatprep.mubr.f32.mxu0 %v27_v6  ;;  %v35_v10 = vld [vmem:[%s324_s1 + $0x30] sm:$0xff]  ;;  %v36_v11 = vld [vmem:[%s324_s1 + $0x38] sm:$0xff] }
   0x4   :  { %199 = vmatprep.subr.bf16.mxu0 %v198_v3  ;;  %v206_v9 = vpack.c.bf16 %v34_v8, %v33_v7  ;;  %v210_v12 = vpack.c.bf16 %v36_v11, %v35_v10  ;;  %v37_v13 = vld [vmem:[%s324_s1 + $0x40] sm:$0xff]  ;;  %v38_v14 = vld [vmem:[%s324_s1 + $0x48] sm:$0xff]  ;;  %v39_v16 = vld [vmem:[%s324_s1 + $0x50] sm:$0xff] }
   0x5   :  { %201 = vmatpush3.bf16.xpose.msra.mxu0 %v198_v3  ;;  %v214_v15 = vpack.c.bf16 %v38_v14, %v37_v13  ;;  %v40_v17 = vld [vmem:[%s324_s1 + $0x58] sm:$0xff]  ;;  %v41_v19 = vld [vmem:[%s324_s1 + $0x60] sm:$0xff]  ;;  %v42_v20 = vld [vmem:[%s324_s1 + $0x68] sm:$0xff] }
   0x6   :  { %203 = vmatprep.subr.bf16.mxu0 %v202_v5  ;;  %v218_v18 = vpack.c.bf16 %v40_v17, %v39_v16  ;;  %v222_v21 = vpack.c.bf16 %v42_v20, %v41_v19  ;;  %v43_v22 = vld [vmem:[%s324_s1 + $0x70] sm:$0xff]  ;;  %v44_v23 = vld [vmem:[%s324_s1 + $0x78] sm:$0xff]  ;;  %v28_v25 = vld [vmem:[%s325_s0 + $0x8] sm:$0xff] }
   0x7   :  { %v226_v24 = vpack.c.bf16 %v44_v23, %v43_v22  ;;  %v22_v26 = vld [vmem:[%s326_s2 + $0x8] sm:$0xff]  ;;  %v21_v27 = vld [vmem:[%s326_s2] sm:$0xff] }
   0x8   :  { %v144_v29 = vld [vmem:[%s327_s3] ss:$0 sm:$0xff] }
   0xd   :  { %205 = vmatpush3.bf16.xpose.msra.mxu0 %v202_v5 }
   0xe   :  { %207 = vmatprep.subr.bf16.mxu0 %v206_v9 }
  0x15   :  { %209 = vmatpush3.bf16.xpose.msra.mxu0 %v206_v9 }
  0x16   :  { %211 = vmatprep.subr.bf16.mxu0 %v210_v12 }
  0x1d   :  { %213 = vmatpush3.bf16.xpose.msra.mxu0 %v210_v12 }
  0x1e   :  { %215 = vmatprep.subr.bf16.mxu0 %v214_v15 }
  0x25   :  { %217 = vmatpush3.bf16.xpose.msra.mxu0 %v214_v15 }
  0x26   :  { %219 = vmatprep.subr.bf16.mxu0 %v218_v18 }
  0x2d   :  { %221 = vmatpush3.bf16.xpose.msra.mxu0 %v218_v18 }
  0x2e   :  { %223 = vmatprep.subr.bf16.mxu0 %v222_v21 }
  0x35   :  { %225 = vmatpush3.bf16.xpose.msra.mxu0 %v222_v21 }
  0x36   :  { %227 = vmatprep.subr.bf16.mxu0 %v226_v24 }
  0x3d   :  { %229 = vmatpush3.bf16.xpose.msra.mxu0 %v226_v24 }
  0x44   :  { %196 = vmatmul.mubr.f32.vlgmr.msra.gmra.mrb[0].mxu0 %v28_v25 }
 0x117   :  { %v197_v28 = vpop.f32.mrb[0].mxu0 }
 0x118   :  { %v121_v30 = vadd.f32 %v197_v28, %v22_v26  ;;  %v111_v31 = vpop.f32.mrb[1].mxu0 }
 0x119   :  { %v120_v32 = vadd.f32 %v111_v31, %v21_v27 }
 0x11a   :  { %v137_v33 = vadd.f32 %v144_v29, %v121_v30 }
 0x11b   :  { %v136_v34 = vadd.f32 %v144_v29, %v120_v32 }
 0x11c   :  { %139 = vst [vmem:[%s328_s4 + $0x8] sm:$0xff] %v137_v33 }
 0x11d   :  { %138 = vst [vmem:[%s328_s4] sm:$0xff] %v136_v34 }

</bundles_post_ra>
